<compile_context>
chip_gen: v7x
topology: tpu7x:2x2x1
jax: 0.10.0
libtpu: 0.0.40
codegen_flags: <defaults>
</compile_context>

<pallas_src>
import functools

import jax
import jax.numpy as jnp
from jax.experimental import pallas as pl
from jax.experimental.pallas import tpu as pltpu


def _attention_kernel(x_ref, gamma_ref, beta_ref, wqkv_ref, wout_ref, bout_ref,
                      o_ref, attn_out_ref, *, heads, dim_head, eps):
    """One grid step = one batch element. All tensors live fully in VMEM."""
    inner = heads * dim_head

    x = x_ref[0].astype(jnp.float32)                               # (N, D)

    # ---- LayerNorm (biased variance, eps=1e-5, affine), single pass over x ----
    mean = jnp.mean(x, axis=-1, keepdims=True)
    mean_sq = jnp.mean(x * x, axis=-1, keepdims=True)
    var = mean_sq - mean * mean
    xn = (x - mean) * jax.lax.rsqrt(var + eps)
    xn = xn * gamma_ref[0].astype(jnp.float32) + beta_ref[0].astype(jnp.float32)

    # ---- QKV projection (no bias). Weights are bf16; softmax scale pre-folded
    #      into the Q columns. f32 accumulation on the MXU. ----
    qkv = jnp.dot(xn.astype(jnp.bfloat16), wqkv_ref[...],
                  preferred_element_type=jnp.float32)              # (N, 3*inner) f32

    # ---- per-head scaled dot-product attention (static unrolled loop) ----
    # Each head's result goes straight into the VMEM scratch slab -> no concat,
    # live vreg set bounded to one head at a time.
    # TODO(synk): batch heads into one dot_general ('hnd,hmd->hnm') to deepen the
    # MXU contraction beyond dim_head; kept per-head + scratch slab for robustness.
    for h in range(heads):
        q = qkv[:, h * dim_head:(h + 1) * dim_head]                          # (N, dh)
        k = qkv[:, inner + h * dim_head:inner + (h + 1) * dim_head]          # (N, dh)
        v = qkv[:, 2 * inner + h * dim_head:2 * inner + (h + 1) * dim_head]  # (N, dh)

        dots = jnp.dot(q.astype(jnp.bfloat16), k.T.astype(jnp.bfloat16),
                       preferred_element_type=jnp.float32)                   # (N, N)
        dots = dots - jnp.max(dots, axis=-1, keepdims=True)
        e = jnp.exp(dots)
        inv_denom = pl.reciprocal(jnp.sum(e, axis=-1, keepdims=True), approx=True)
        attn = e * inv_denom
        head_out = jnp.dot(attn.astype(jnp.bfloat16), v.astype(jnp.bfloat16),
                           preferred_element_type=jnp.float32)               # (N, dh)
        attn_out_ref[:, h * dim_head:(h + 1) * dim_head] = head_out.astype(jnp.bfloat16)

    # ---- output projection (Linear with bias) ----
    y = jnp.dot(attn_out_ref[...], wout_ref[...],
                preferred_element_type=jnp.float32) + bout_ref[0].astype(jnp.float32)
    o_ref[0] = y.astype(o_ref.dtype)


def prepare_kernel_params(params, *, heads, dim_head):
    """One-time param prep: fold softmax scale into Q columns of W_qkv and cast the
    MXU-weight matrices to bf16. LayerNorm affine and output bias stay f32."""
    inner = heads * dim_head
    scale = dim_head ** -0.5
    w_qkv = jnp.asarray(params["w_qkv"])
    w_qkv = w_qkv.at[:, :inner].multiply(scale)
    return {
        "gamma": jnp.asarray(params["gamma"], jnp.float32),
        "beta": jnp.asarray(params["beta"], jnp.float32),
        "w_qkv": w_qkv.astype(jnp.bfloat16),
        "w_out": jnp.asarray(params["w_out"]).astype(jnp.bfloat16),
        "b_out": jnp.asarray(params["b_out"], jnp.float32),
    }


def attention_forward(x, kparams, *, heads, dim_head):
    """x: (B, N, D) float32. kparams: output of prepare_kernel_params. Returns (B, N, D)."""
    B, N, D = x.shape
    inner = heads * dim_head

    kernel = functools.partial(_attention_kernel, heads=heads, dim_head=dim_head,
                               eps=1e-5)

    # Explicit VMEM budget: double-buffered pipeline copies of every operand block
    # + scratch slab + generous in-kernel temporaries.
    f32, bf16 = 4, 2
    blocks = 2 * (N * D * f32                 # x block
                  + N * D * f32               # out block
                  + D * 3 * inner * bf16      # W_qkv
                  + inner * D * bf16          # W_out
                  + 3 * D * f32)              # gamma, beta, b_out
    scratch = N * inner * bf16
    temps = N * 3 * inner * f32 + 4 * N * N * f32 + 2 * N * inner * f32
    vmem_limit = int(min(max(2 * (blocks + scratch + temps), 32 << 20), 64 << 20))

    # TODO(synk): for very large N on v7x (64 MiB VMEM), add a query-tile grid axis
    # with an online-softmax (flash-style) accumulator; unnecessary at these sizes.
    grid_spec = pltpu.PrefetchScalarGridSpec(
        num_scalar_prefetch=0,
        grid=(B,),
        in_specs=[
            pl.BlockSpec((1, N, D), lambda b: (b, 0, 0)),          # x
            pl.BlockSpec((1, D), lambda b: (0, 0)),                # layernorm gamma
            pl.BlockSpec((1, D), lambda b: (0, 0)),                # layernorm beta
            pl.BlockSpec((D, 3 * inner), lambda b: (0, 0)),        # W_qkv (bf16, scale-folded)
            pl.BlockSpec((inner, D), lambda b: (0, 0)),            # W_out (bf16)
            pl.BlockSpec((1, D), lambda b: (0, 0)),                # b_out
        ],
        out_specs=pl.BlockSpec((1, N, D), lambda b: (b, 0, 0)),
        scratch_shapes=[pltpu.VMEM((N, inner), jnp.bfloat16)],     # per-head output slab
    )

    return pl.pallas_call(
        kernel,
        out_shape=jax.ShapeDtypeStruct((B, N, D), x.dtype),
        grid_spec=grid_spec,
        compiler_params=pltpu.CompilerParams(
            dimension_semantics=("parallel",),
            vmem_limit_bytes=vmem_limit,
        ),
    )(x, kparams["gamma"], kparams["beta"], kparams["w_qkv"],
      kparams["w_out"], kparams["b_out"])


def reference_forward(x, params, *, heads, dim_head):
    """Pure-JAX f32 reference mirroring the PyTorch module (dropout=0)."""
    B, N, D = x.shape
    inner = heads * dim_head
    scale = dim_head ** -0.5

    mean = jnp.mean(x, axis=-1, keepdims=True)
    var = jnp.mean((x - mean) ** 2, axis=-1, keepdims=True)
    xn = (x - mean) / jnp.sqrt(var + 1e-5)
    xn = xn * params["gamma"][0] + params["beta"][0]

    qkv = xn @ params["w_qkv"]                                # (B, N, 3*inner)
    q, k, v = jnp.split(qkv, 3, axis=-1)

    def to_heads(t):
        return t.reshape(B, N, heads, dim_head).transpose(0, 2, 1, 3)  # (B, H, N, dh)

    q, k, v = map(to_heads, (q, k, v))
    dots = jnp.einsum("bhnd,bhmd->bhnm", q, k) * scale
    attn = jax.nn.softmax(dots, axis=-1)
    out = jnp.einsum("bhnm,bhmd->bhnd", attn, v)
    out = out.transpose(0, 2, 1, 3).reshape(B, N, inner)
    return out @ params["w_out"] + params["b_out"][0]


if __name__ == "__main__":
    # Small but lane-dense shapes (D = inner = 128 -> full-width output stores).
    B, N, D = 2, 8, 128
    HEADS, DIM_HEAD = 4, 32
    INNER = HEADS * DIM_HEAD

    key = jax.random.PRNGKey(0)
    kx, kg, kb, kq, ko, kob = jax.random.split(key, 6)

    x = jax.random.normal(kx, (B, N, D), dtype=jnp.float32)

    params = {
        "gamma": jax.random.normal(kg, (1, D), dtype=jnp.float32) * 0.1 + 1.0,
        "beta": jax.random.normal(kb, (1, D), dtype=jnp.float32) * 0.1,
        "w_qkv": jax.random.normal(kq, (D, 3 * INNER), dtype=jnp.float32) * (D ** -0.5),
        "w_out": jax.random.normal(ko, (INNER, D), dtype=jnp.float32) * (INNER ** -0.5),
        "b_out": jax.random.normal(kob, (1, D), dtype=jnp.float32) * 0.02,
    }

    kparams = prepare_kernel_params(params, heads=HEADS, dim_head=DIM_HEAD)

    y = attention_forward(x, kparams, heads=HEADS, dim_head=DIM_HEAD)
    y = jax.block_until_ready(y)

    y_ref = reference_forward(x, params, heads=HEADS, dim_head=DIM_HEAD)
    assert y.shape == (B, N, D)

    # bf16 MXU operands + approx reciprocal loosen the tolerance vs pure-f32.
    max_err = float(jnp.max(jnp.abs(y - y_ref)))
    ref_scale = float(jnp.max(jnp.abs(y_ref)))
    assert max_err <= 0.08 * ref_scale + 1e-2, (
        f"mismatch vs reference: max_err={max_err:.4f}, ref_scale={ref_scale:.4f}")

    print("KERNEL_OK")
</pallas_src>

<mosaic_0001>
module attributes {stable_mosaic.version = 11 : i64} {
  func.func @_attention_kernel(%arg0: i32, %arg1: memref<1x8x128xf32, #tpu.memory_space<vmem>>, %arg2: memref<1x128xf32, #tpu.memory_space<vmem>>, %arg3: memref<1x128xf32, #tpu.memory_space<vmem>>, %arg4: memref<128x384xbf16, #tpu.memory_space<vmem>>, %arg5: memref<128x128xbf16, #tpu.memory_space<vmem>>, %arg6: memref<1x128xf32, #tpu.memory_space<vmem>>, %arg7: memref<1x8x128xf32, #tpu.memory_space<vmem>>, %arg8: memref<8x128xbf16, #tpu.memory_space<vmem>>) attributes {dimension_semantics = [#tpu.dimension_semantics<parallel>], iteration_bounds = array<i64: 2>, scalar_prefetch = 0 : i64, scratch_operands = 1 : i64, tpu.core_type = #tpu.core_type<tc>, window_params = [{transform_indices = @transform_0, window_bounds = array<i64: 1, 8, 128>}, {pipeline_mode = #tpu.pipeline_mode<synchronous>, transform_indices = @transform_1, window_bounds = array<i64: 1, 128>}, {pipeline_mode = #tpu.pipeline_mode<synchronous>, transform_indices = @transform_2, window_bounds = array<i64: 1, 128>}, {pipeline_mode = #tpu.pipeline_mode<synchronous>, transform_indices = @transform_3, window_bounds = array<i64: 128, 384>}, {pipeline_mode = #tpu.pipeline_mode<synchronous>, transform_indices = @transform_4, window_bounds = array<i64: 128, 128>}, {pipeline_mode = #tpu.pipeline_mode<synchronous>, transform_indices = @transform_5, window_bounds = array<i64: 1, 128>}, {transform_indices = @transform_6, window_bounds = array<i64: 1, 8, 128>}]} {
    %c0 = arith.constant 0 : index
    %c0_0 = arith.constant 0 : index
    %c0_1 = arith.constant 0 : index
    %0 = vector.load %arg1[%c0, %c0_0, %c0_1] : memref<1x8x128xf32, #tpu.memory_space<vmem>>, vector<1x8x128xf32>
    %1 = vector.shape_cast %0 : vector<1x8x128xf32> to vector<8x128xf32>
    %cst = arith.constant dense<0.000000e+00> : vector<8xf32>
    %2 = vector.multi_reduction <add>, %1, %cst [1] : vector<8x128xf32> to vector<8xf32>
    %3 = vector.shape_cast %2 : vector<8xf32> to vector<8x1xf32>
    %cst_2 = arith.constant 1.280000e+02 : f32
    %4 = vector.broadcast %cst_2 : f32 to vector<8x1xf32>
    %5 = arith.divf %3, %4 : vector<8x1xf32>
    %6 = arith.mulf %1, %1 : vector<8x128xf32>
    %cst_3 = arith.constant dense<0.000000e+00> : vector<8xf32>
    %7 = vector.multi_reduction <add>, %6, %cst_3 [1] : vector<8x128xf32> to vector<8xf32>
    %8 = vector.shape_cast %7 : vector<8xf32> to vector<8x1xf32>
    %cst_4 = arith.constant 1.280000e+02 : f32
    %9 = vector.broadcast %cst_4 : f32 to vector<8x1xf32>
    %10 = arith.divf %8, %9 : vector<8x1xf32>
    %11 = arith.mulf %5, %5 : vector<8x1xf32>
    %12 = arith.subf %10, %11 : vector<8x1xf32>
    %13 = vector.broadcast %5 : vector<8x1xf32> to vector<8x128xf32>
    %14 = arith.subf %1, %13 : vector<8x128xf32>
    %cst_5 = arith.constant 9.99999974E-6 : f32
    %15 = vector.broadcast %cst_5 : f32 to vector<8x1xf32>
    %16 = arith.addf %12, %15 : vector<8x1xf32>
    %17 = math.rsqrt %16 : vector<8x1xf32>
    %18 = vector.broadcast %17 : vector<8x1xf32> to vector<8x128xf32>
    %19 = arith.mulf %14, %18 : vector<8x128xf32>
    %c0_6 = arith.constant 0 : index
    %c0_7 = arith.constant 0 : index
    %20 = vector.load %arg2[%c0_6, %c0_7] : memref<1x128xf32, #tpu.memory_space<vmem>>, vector<1x128xf32>
    %21 = vector.shape_cast %20 : vector<1x128xf32> to vector<128xf32>
    %22 = vector.shape_cast %21 : vector<128xf32> to vector<1x128xf32>
    %23 = vector.broadcast %22 : vector<1x128xf32> to vector<8x128xf32>
    %24 = arith.mulf %19, %23 : vector<8x128xf32>
    %c0_8 = arith.constant 0 : index
    %c0_9 = arith.constant 0 : index
    %25 = vector.load %arg3[%c0_8, %c0_9] : memref<1x128xf32, #tpu.memory_space<vmem>>, vector<1x128xf32>
    %26 = vector.shape_cast %25 : vector<1x128xf32> to vector<128xf32>
    %27 = vector.shape_cast %26 : vector<128xf32> to vector<1x128xf32>
    %28 = vector.broadcast %27 : vector<1x128xf32> to vector<8x128xf32>
    %29 = arith.addf %24, %28 : vector<8x128xf32>
    %30 = arith.truncf %29 : vector<8x128xf32> to vector<8x128xbf16>
    %c0_10 = arith.constant 0 : index
    %c0_11 = arith.constant 0 : index
    %31 = vector.load %arg4[%c0_10, %c0_11] : memref<128x384xbf16, #tpu.memory_space<vmem>>, vector<128x384xbf16>
    %cst_12 = arith.constant dense<0.000000e+00> : vector<8x384xf32>
    %32 = tpu.matmul %30, %31, %cst_12 {dimension_numbers = #tpu.dot_dimension_numbers<[1], [0], [0], [1], [0, 0, 1, 1], [], []>} : vector<8x128xbf16>, vector<128x384xbf16>, vector<8x384xf32> -> vector<8x384xf32>
    %33 = vector.extract_strided_slice %32 {offsets = [0, 0], sizes = [8, 32], strides = [1, 1]} : vector<8x384xf32> to vector<8x32xf32>
    %34 = vector.extract_strided_slice %32 {offsets = [0, 128], sizes = [8, 32], strides = [1, 1]} : vector<8x384xf32> to vector<8x32xf32>
    %35 = vector.extract_strided_slice %32 {offsets = [0, 256], sizes = [8, 32], strides = [1, 1]} : vector<8x384xf32> to vector<8x32xf32>
    %36 = arith.truncf %33 : vector<8x32xf32> to vector<8x32xbf16>
    %37 = tpu.transpose %34, [1, 0] : vector<8x32xf32> -> vector<32x8xf32>
    %38 = arith.truncf %37 : vector<32x8xf32> to vector<32x8xbf16>
    %cst_13 = arith.constant dense<0.000000e+00> : vector<8x8xf32>
    %39 = tpu.matmul %36, %38, %cst_13 {dimension_numbers = #tpu.dot_dimension_numbers<[1], [0], [0], [1], [0, 0, 1, 1], [], []>} : vector<8x32xbf16>, vector<32x8xbf16>, vector<8x8xf32> -> vector<8x8xf32>
    %cst_14 = arith.constant dense<0xFF800000> : vector<8xf32>
    %40 = vector.multi_reduction <maximumf>, %39, %cst_14 [1] : vector<8x8xf32> to vector<8xf32>
    %41 = vector.shape_cast %40 : vector<8xf32> to vector<8x1xf32>
    %42 = vector.broadcast %41 : vector<8x1xf32> to vector<8x8xf32>
    %43 = arith.subf %39, %42 : vector<8x8xf32>
    %44 = math.exp %43 : vector<8x8xf32>
    %cst_15 = arith.constant dense<0.000000e+00> : vector<8xf32>
    %45 = vector.multi_reduction <add>, %44, %cst_15 [1] : vector<8x8xf32> to vector<8xf32>
    %46 = vector.shape_cast %45 : vector<8xf32> to vector<8x1xf32>
    %47 = tpu.reciprocal %46 {approx = true} : vector<8x1xf32> -> vector<8x1xf32>
    %48 = vector.broadcast %47 : vector<8x1xf32> to vector<8x8xf32>
    %49 = arith.mulf %44, %48 : vector<8x8xf32>
    %50 = arith.truncf %49 : vector<8x8xf32> to vector<8x8xbf16>
    %51 = arith.truncf %35 : vector<8x32xf32> to vector<8x32xbf16>
    %cst_16 = arith.constant dense<0.000000e+00> : vector<8x32xf32>
    %52 = tpu.matmul %50, %51, %cst_16 {dimension_numbers = #tpu.dot_dimension_numbers<[1], [0], [0], [1], [0, 0, 1, 1], [], []>} : vector<8x8xbf16>, vector<8x32xbf16>, vector<8x32xf32> -> vector<8x32xf32>
    %53 = arith.truncf %52 : vector<8x32xf32> to vector<8x32xbf16>
    %c0_17 = arith.constant 0 : index
    %c0_18 = arith.constant 0 : index
    %54 = vector.load %arg8[%c0_17, %c0_18] : memref<8x128xbf16, #tpu.memory_space<vmem>>, vector<8x32xbf16>
    tpu.vector_store %arg8[%c0_17, %c0_18], %53 {strides = array<i32>} : memref<8x128xbf16, #tpu.memory_space<vmem>>, vector<8x32xbf16>,
    %55 = vector.extract_strided_slice %32 {offsets = [0, 32], sizes = [8, 32], strides = [1, 1]} : vector<8x384xf32> to vector<8x32xf32>
    %56 = vector.extract_strided_slice %32 {offsets = [0, 160], sizes = [8, 32], strides = [1, 1]} : vector<8x384xf32> to vector<8x32xf32>
    %57 = vector.extract_strided_slice %32 {offsets = [0, 288], sizes = [8, 32], strides = [1, 1]} : vector<8x384xf32> to vector<8x32xf32>
    %58 = arith.truncf %55 : vector<8x32xf32> to vector<8x32xbf16>
    %59 = tpu.transpose %56, [1, 0] : vector<8x32xf32> -> vector<32x8xf32>
    %60 = arith.truncf %59 : vector<32x8xf32> to vector<32x8xbf16>
    %cst_19 = arith.constant dense<0.000000e+00> : vector<8x8xf32>
    %61 = tpu.matmul %58, %60, %cst_19 {dimension_numbers = #tpu.dot_dimension_numbers<[1], [0], [0], [1], [0, 0, 1, 1], [], []>} : vector<8x32xbf16>, vector<32x8xbf16>, vector<8x8xf32> -> vector<8x8xf32>
    %cst_20 = arith.constant dense<0xFF800000> : vector<8xf32>
    %62 = vector.multi_reduction <maximumf>, %61, %cst_20 [1] : vector<8x8xf32> to vector<8xf32>
    %63 = vector.shape_cast %62 : vector<8xf32> to vector<8x1xf32>
    %64 = vector.broadcast %63 : vector<8x1xf32> to vector<8x8xf32>
    %65 = arith.subf %61, %64 : vector<8x8xf32>
    %66 = math.exp %65 : vector<8x8xf32>
    %cst_21 = arith.constant dense<0.000000e+00> : vector<8xf32>
    %67 = vector.multi_reduction <add>, %66, %cst_21 [1] : vector<8x8xf32> to vector<8xf32>
    %68 = vector.shape_cast %67 : vector<8xf32> to vector<8x1xf32>
    %69 = tpu.reciprocal %68 {approx = true} : vector<8x1xf32> -> vector<8x1xf32>
    %70 = vector.broadcast %69 : vector<8x1xf32> to vector<8x8xf32>
    %71 = arith.mulf %66, %70 : vector<8x8xf32>
    %72 = arith.truncf %71 : vector<8x8xf32> to vector<8x8xbf16>
    %73 = arith.truncf %57 : vector<8x32xf32> to vector<8x32xbf16>
    %cst_22 = arith.constant dense<0.000000e+00> : vector<8x32xf32>
    %74 = tpu.matmul %72, %73, %cst_22 {dimension_numbers = #tpu.dot_dimension_numbers<[1], [0], [0], [1], [0, 0, 1, 1], [], []>} : vector<8x8xbf16>, vector<8x32xbf16>, vector<8x32xf32> -> vector<8x32xf32>
    %75 = arith.truncf %74 : vector<8x32xf32> to vector<8x32xbf16>
    %c0_23 = arith.constant 0 : index
    %c32 = arith.constant 32 : index
    %76 = vector.load %arg8[%c0_23, %c32] : memref<8x128xbf16, #tpu.memory_space<vmem>>, vector<8x32xbf16>
    tpu.vector_store %arg8[%c0_23, %c32], %75 {strides = array<i32>} : memref<8x128xbf16, #tpu.memory_space<vmem>>, vector<8x32xbf16>,
    %77 = vector.extract_strided_slice %32 {offsets = [0, 64], sizes = [8, 32], strides = [1, 1]} : vector<8x384xf32> to vector<8x32xf32>
    %78 = vector.extract_strided_slice %32 {offsets = [0, 192], sizes = [8, 32], strides = [1, 1]} : vector<8x384xf32> to vector<8x32xf32>
    %79 = vector.extract_strided_slice %32 {offsets = [0, 320], sizes = [8, 32], strides = [1, 1]} : vector<8x384xf32> to vector<8x32xf32>
    %80 = arith.truncf %77 : vector<8x32xf32> to vector<8x32xbf16>
    %81 = tpu.transpose %78, [1, 0] : vector<8x32xf32> -> vector<32x8xf32>
    %82 = arith.truncf %81 : vector<32x8xf32> to vector<32x8xbf16>
    %cst_24 = arith.constant dense<0.000000e+00> : vector<8x8xf32>
    %83 = tpu.matmul %80, %82, %cst_24 {dimension_numbers = #tpu.dot_dimension_numbers<[1], [0], [0], [1], [0, 0, 1, 1], [], []>} : vector<8x32xbf16>, vector<32x8xbf16>, vector<8x8xf32> -> vector<8x8xf32>
    %cst_25 = arith.constant dense<0xFF800000> : vector<8xf32>
    %84 = vector.multi_reduction <maximumf>, %83, %cst_25 [1] : vector<8x8xf32> to vector<8xf32>
    %85 = vector.shape_cast %84 : vector<8xf32> to vector<8x1xf32>
    %86 = vector.broadcast %85 : vector<8x1xf32> to vector<8x8xf32>
    %87 = arith.subf %83, %86 : vector<8x8xf32>
    %88 = math.exp %87 : vector<8x8xf32>
    %cst_26 = arith.constant dense<0.000000e+00> : vector<8xf32>
    %89 = vector.multi_reduction <add>, %88, %cst_26 [1] : vector<8x8xf32> to vector<8xf32>
    %90 = vector.shape_cast %89 : vector<8xf32> to vector<8x1xf32>
    %91 = tpu.reciprocal %90 {approx = true} : vector<8x1xf32> -> vector<8x1xf32>
    %92 = vector.broadcast %91 : vector<8x1xf32> to vector<8x8xf32>
    %93 = arith.mulf %88, %92 : vector<8x8xf32>
    %94 = arith.truncf %93 : vector<8x8xf32> to vector<8x8xbf16>
    %95 = arith.truncf %79 : vector<8x32xf32> to vector<8x32xbf16>
    %cst_27 = arith.constant dense<0.000000e+00> : vector<8x32xf32>
    %96 = tpu.matmul %94, %95, %cst_27 {dimension_numbers = #tpu.dot_dimension_numbers<[1], [0], [0], [1], [0, 0, 1, 1], [], []>} : vector<8x8xbf16>, vector<8x32xbf16>, vector<8x32xf32> -> vector<8x32xf32>
    %97 = arith.truncf %96 : vector<8x32xf32> to vector<8x32xbf16>
    %c0_28 = arith.constant 0 : index
    %c64 = arith.constant 64 : index
    %98 = vector.load %arg8[%c0_28, %c64] : memref<8x128xbf16, #tpu.memory_space<vmem>>, vector<8x32xbf16>
    tpu.vector_store %arg8[%c0_28, %c64], %97 {strides = array<i32>} : memref<8x128xbf16, #tpu.memory_space<vmem>>, vector<8x32xbf16>,
    %99 = vector.extract_strided_slice %32 {offsets = [0, 96], sizes = [8, 32], strides = [1, 1]} : vector<8x384xf32> to vector<8x32xf32>
    %100 = vector.extract_strided_slice %32 {offsets = [0, 224], sizes = [8, 32], strides = [1, 1]} : vector<8x384xf32> to vector<8x32xf32>
    %101 = vector.extract_strided_slice %32 {offsets = [0, 352], sizes = [8, 32], strides = [1, 1]} : vector<8x384xf32> to vector<8x32xf32>
    %102 = arith.truncf %99 : vector<8x32xf32> to vector<8x32xbf16>
    %103 = tpu.transpose %100, [1, 0] : vector<8x32xf32> -> vector<32x8xf32>
    %104 = arith.truncf %103 : vector<32x8xf32> to vector<32x8xbf16>
    %cst_29 = arith.constant dense<0.000000e+00> : vector<8x8xf32>
    %105 = tpu.matmul %102, %104, %cst_29 {dimension_numbers = #tpu.dot_dimension_numbers<[1], [0], [0], [1], [0, 0, 1, 1], [], []>} : vector<8x32xbf16>, vector<32x8xbf16>, vector<8x8xf32> -> vector<8x8xf32>
    %cst_30 = arith.constant dense<0xFF800000> : vector<8xf32>
    %106 = vector.multi_reduction <maximumf>, %105, %cst_30 [1] : vector<8x8xf32> to vector<8xf32>
    %107 = vector.shape_cast %106 : vector<8xf32> to vector<8x1xf32>
    %108 = vector.broadcast %107 : vector<8x1xf32> to vector<8x8xf32>
    %109 = arith.subf %105, %108 : vector<8x8xf32>
    %110 = math.exp %109 : vector<8x8xf32>
    %cst_31 = arith.constant dense<0.000000e+00> : vector<8xf32>
    %111 = vector.multi_reduction <add>, %110, %cst_31 [1] : vector<8x8xf32> to vector<8xf32>
    %112 = vector.shape_cast %111 : vector<8xf32> to vector<8x1xf32>
    %113 = tpu.reciprocal %112 {approx = true} : vector<8x1xf32> -> vector<8x1xf32>
    %114 = vector.broadcast %113 : vector<8x1xf32> to vector<8x8xf32>
    %115 = arith.mulf %110, %114 : vector<8x8xf32>
    %116 = arith.truncf %115 : vector<8x8xf32> to vector<8x8xbf16>
    %117 = arith.truncf %101 : vector<8x32xf32> to vector<8x32xbf16>
    %cst_32 = arith.constant dense<0.000000e+00> : vector<8x32xf32>
    %118 = tpu.matmul %116, %117, %cst_32 {dimension_numbers = #tpu.dot_dimension_numbers<[1], [0], [0], [1], [0, 0, 1, 1], [], []>} : vector<8x8xbf16>, vector<8x32xbf16>, vector<8x32xf32> -> vector<8x32xf32>
    %119 = arith.truncf %118 : vector<8x32xf32> to vector<8x32xbf16>
    %c0_33 = arith.constant 0 : index
    %c96 = arith.constant 96 : index
    %120 = vector.load %arg8[%c0_33, %c96] : memref<8x128xbf16, #tpu.memory_space<vmem>>, vector<8x32xbf16>
    tpu.vector_store %arg8[%c0_33, %c96], %119 {strides = array<i32>} : memref<8x128xbf16, #tpu.memory_space<vmem>>, vector<8x32xbf16>,
    %c0_34 = arith.constant 0 : index
    %c0_35 = arith.constant 0 : index
    %121 = vector.load %arg8[%c0_34, %c0_35] : memref<8x128xbf16, #tpu.memory_space<vmem>>, vector<8x128xbf16>
    %c0_36 = arith.constant 0 : index
    %c0_37 = arith.constant 0 : index
    %122 = vector.load %arg5[%c0_36, %c0_37] : memref<128x128xbf16, #tpu.memory_space<vmem>>, vector<128x128xbf16>
    %cst_38 = arith.constant dense<0.000000e+00> : vector<8x128xf32>
    %123 = tpu.matmul %121, %122, %cst_38 {dimension_numbers = #tpu.dot_dimension_numbers<[1], [0], [0], [1], [0, 0, 1, 1], [], []>} : vector<8x128xbf16>, vector<128x128xbf16>, vector<8x128xf32> -> vector<8x128xf32>
    %c0_39 = arith.constant 0 : index
    %c0_40 = arith.constant 0 : index
    %124 = vector.load %arg6[%c0_39, %c0_40] : memref<1x128xf32, #tpu.memory_space<vmem>>, vector<1x128xf32>
    %125 = vector.shape_cast %124 : vector<1x128xf32> to vector<128xf32>
    %126 = vector.shape_cast %125 : vector<128xf32> to vector<1x128xf32>
    %127 = vector.broadcast %126 : vector<1x128xf32> to vector<8x128xf32>
    %128 = arith.addf %123, %127 : vector<8x128xf32>
    %c0_41 = arith.constant 0 : index
    %c0_42 = arith.constant 0 : index
    %c0_43 = arith.constant 0 : index
    %129 = vector.load %arg7[%c0_41, %c0_42, %c0_43] : memref<1x8x128xf32, #tpu.memory_space<vmem>>, vector<1x8x128xf32>
    %130 = vector.shape_cast %129 : vector<1x8x128xf32> to vector<8x128xf32>
    %131 = vector.shape_cast %128 : vector<8x128xf32> to vector<1x8x128xf32>
    tpu.vector_store %arg7[%c0_41, %c0_42, %c0_43], %131 {strides = array<i32>} : memref<1x8x128xf32, #tpu.memory_space<vmem>>, vector<1x8x128xf32>,
    return
  }
  func.func @transform_0(%arg0: i32) -> (i32, i32, i32) {
    %c0_i32 = arith.constant 0 : i32
    %c0_i32_0 = arith.constant 0 : i32
    %c0_i32_1 = arith.constant 0 : i32
    return %arg0, %c0_i32, %c0_i32_0 : i32, i32, i32
  }
  func.func @transform_1(%arg0: i32) -> (i32, i32) {
    %c0_i32 = arith.constant 0 : i32
    %c0_i32_0 = arith.constant 0 : i32
    %c0_i32_1 = arith.constant 0 : i32
    return %c0_i32, %c0_i32_0 : i32, i32
  }
  func.func @transform_2(%arg0: i32) -> (i32, i32) {
    %c0_i32 = arith.constant 0 : i32
    %c0_i32_0 = arith.constant 0 : i32
    %c0_i32_1 = arith.constant 0 : i32
    return %c0_i32, %c0_i32_0 : i32, i32
  }
  func.func @transform_3(%arg0: i32) -> (i32, i32) {
    %c0_i32 = arith.constant 0 : i32
    %c0_i32_0 = arith.constant 0 : i32
    %c0_i32_1 = arith.constant 0 : i32
    return %c0_i32, %c0_i32_0 : i32, i32
  }
  func.func @transform_4(%arg0: i32) -> (i32, i32) {
    %c0_i32 = arith.constant 0 : i32
    %c0_i32_0 = arith.constant 0 : i32
    %c0_i32_1 = arith.constant 0 : i32
    return %c0_i32, %c0_i32_0 : i32, i32
  }
  func.func @transform_5(%arg0: i32) -> (i32, i32) {
    %c0_i32 = arith.constant 0 : i32
    %c0_i32_0 = arith.constant 0 : i32
    %c0_i32_1 = arith.constant 0 : i32
    return %c0_i32, %c0_i32_0 : i32, i32
  }
  func.func @transform_6(%arg0: i32) -> (i32, i32, i32) {
    %c0_i32 = arith.constant 0 : i32
    %c0_i32_0 = arith.constant 0 : i32
    %c0_i32_1 = arith.constant 0 : i32
    return %arg0, %c0_i32, %c0_i32_0 : i32, i32, i32
  }
}

</mosaic_0001>

<bundles_post_ra>
// kernel: tpu_custom_call.1
= control target key start
LH: loop header
LB: loop body
LE: loop exit
PB: predicated region body
PF: predicated region fallthrough
CT: control target
= control target key end

     0   :  { %11 = vsyncpa [#allocation4], 0  ;;  %s2282_s0 = inlined_call_operand.hbm [shape: f32[2,8,128], index: 0, kind: input, shape index: {}]   ;;  %s2283_s1 = inlined_call_operand.vmem [shape: f32[1,128], index: 1, kind: input, shape index: {}]   ;;  %s2284_s2 = inlined_call_operand.vmem [shape: f32[1,128], index: 2, kind: input, shape index: {}]   ;;  %s2285_s3 = inlined_call_operand.hbm [shape: bf16[128,384], index: 3, kind: input, shape index: {}]   ;;  %s2286_s4 = inlined_call_operand.hbm [shape: bf16[128,128], index: 4, kind: input, shape index: {}]   ;;  %s2287_s5 = inlined_call_operand.vmem [shape: f32[1,128], index: 5, kind: input, shape index: {}]   ;;  %s2288_s6 = inlined_call_operand.hbm [shape: f32[2,8,128], index: 6, kind: output, shape index: {}]  }
   0x1   :  { %13 = vsyncpa [#allocation4 + $0x1], 0 }
   0x2   :  { %14 = vsyncpa [#allocation7], 0 }
   0x3   :  { %15 = vsyncpa [#allocation5], 0 }
   0x4   :  { %17 = vsyncpa [#allocation5 + $0x1], 0  ;;  %s1948_s21 = smov 0   ;;  %s1950_s22 = smov 0  }
   0x5   :  { %s1952_s23 = smov 0   ;;  %s1954_s24 = smov 0  }
   0x6 LB: > { %s1969_s25 = sadd.s32 4294967295, %s1897_s24   ;;  %s1385_s26 = sadd.s32 4294967294, %s1897_s24   ;;  %s1897_s24 = sphi %s1954_s24, %s2308_s24   ;;  %s1893_s23 = sphi %s1952_s23, %s2307_s23   ;;  %s1889_s22 = sphi %s1950_s22, %s2306_s22   ;;  %s1885_s21 = sphi %s1948_s21, %s2305_s21  }
   0x7   : > { %p43_p0 = scmp.ne.s32.totalorder %s1889_s22, %s1885_s21  ;;  %p2289_p1 = scmp.eq.s32.totalorder %s1969_s25, 0 }
   0x8   : > { %p178_p3 = scmp.eq.s32.totalorder %s1385_s26, 1  ;;  %p1386_p5 = scmp.ge.s32.totalorder %s1897_s24, 1 }
   0x9   : > { %p1978_p4 = por %p2289_p1, %p43_p0  ;;  %p185_p7 = scmp.lt.s32.totalorder %s1897_s24, 3 }
   0xa   : > { %p1983_p6 = por %p178_p3, %p43_p0  ;;  %s1899_s30 = smov [#allocation6]  }
   0xb   : > { %s2292_s27 = scalar_select %p1978_p4, 1, 0 }
   0xc   : > { %s2293_s28 = scalar_select %p1983_p6, 1, 0 }
   0xd   : > { %p1988_p8 = pnand %p1386_p5, %p185_p7  ;;  %s203_s7 = sshll.u32 %s1899_s30, 4  ;;  %s1992_s7 = int_to_ptr.vmem [resolvable:$true] %s203_s7 }
   0xe   : > { %s1900_s9 = smov [#allocation8]   ;;  %s1741_s13 = scalar_lea.hbm %s2285_s3, 3072 }
   0xf   : > { %p1596_p9 = pneg %p1988_p8  ;;  %s216_s10 = sshll.u32 %s1900_s9, 4  ;;  %s2003_s10 = int_to_ptr.vmem [resolvable:$true] %s216_s10 }
  0x10   : > { %p1742_p12 = scmp.ne.s32.totalorder %s2285_s3, %s1741_s13  ;;  %p1748_p5 = scmp.lt.u32.totalorder %s1741_s13, %s2285_s3 }
  0x11   : > { %p1999_p11 = pnand %p1596_p9, %p2289_p1 }
  0x13   : > { %p1743_p13 = pneg %p1999_p11 }
  0x15   : > { %p1744_p0 = pnand %p1743_p13, %p1742_p12 }
  0x17   : > { %p1745_p3 = pneg %p1744_p0 }
  0x19   : > { %p1750_p7 = pnand %p1748_p5, %p1745_p3 }
  0x1b   : > { %1753 = shalt.err (!%p1750_p7)
}
  0x1c   : > { %s1754_s18 = scalar_lea.vmem %s1992_s7, 3072  ;;  %p1762_p2 = scmp.lt.s32.totalorder %s1992_s7, %s1992_s7 }
  0x1d   : > { %p1755_p9 = scmp.ne.s32.totalorder %s1992_s7, %s1754_s18  ;;  %p1763_p12 = scmp.lt.s32.totalorder %s1754_s18, %s1754_s18 }
  0x1f   : > { %p1757_p10 = pnand %p1755_p9, %p1743_p13  ;;  %p1764_p0 = por %p1763_p12, %p1762_p2 }
  0x21   : > { %p1758_p1 = pneg %p1757_p10 }
  0x23   : > { %p1765_p6 = pnand %p1764_p0, %p1758_p1 }
  0x25   : > { %1768 = shalt.err (!%p1765_p6)
}
  0x26   : > { %s1901_s19 = smov 192   ;;  %s1902_s20 = smov 12  }
  0x27   : > { %1599 = dma.hbm_to_vmem [thread:$0]  (!%p1999_p11), %s2285_s3, 3072, %s1992_s7, [#allocation7], %s1901_s19, %s1901_s19, %s1902_s20  }
  0x28   : > { %s1769_s12 = scalar_lea.hbm %s2286_s4, 1024 }
  0x29   : > { %p1770_p2 = scmp.ne.s32.totalorder %s2286_s4, %s1769_s12  ;;  %p1776_p10 = scmp.lt.u32.totalorder %s1769_s12, %s2286_s4 }
  0x2b   : > { %p1772_p1 = pnand %p1770_p2, %p1743_p13 }
  0x2d   : > { %p1773_p6 = pneg %p1772_p1 }
  0x2f   : > { %p1778_p3 = pnand %p1776_p10, %p1773_p6 }
  0x31   : > { %1781 = shalt.err (!%p1778_p3)
}
  0x32   : > { %s1782_s7 = scalar_lea.vmem %s2003_s10, 1024  ;;  %p1790_p12 = scmp.lt.s32.totalorder %s2003_s10, %s2003_s10 }
  0x33   : > { %p1783_p5 = scmp.ne.s32.totalorder %s2003_s10, %s1782_s7  ;;  %p1791_p0 = scmp.lt.s32.totalorder %s1782_s7, %s1782_s7 }
  0x35   : > { %p1785_p7 = pnand %p1783_p5, %p1743_p13  ;;  %p1792_p2 = por %p1791_p0, %p1790_p12 }
  0x37   : > { %p1786_p9 = pneg %p1785_p7 }
  0x39   : > { %p1793_p1 = pnand %p1792_p2, %p1786_p9 }
  0x3b   : > { %1796 = shalt.err (!%p1793_p1)
}
  0x3c   : > { %s1903_s17 = smov 64   ;;  %s1904_s18 = smov 4  }
  0x3d   : > { %1602 = dma.hbm_to_vmem [thread:$0]  (!%p1999_p11), %s2286_s4, 1024, %s2003_s10, [#allocation7], %s1903_s17, %s1903_s17, %s1904_s18  }
  0x3e   : > { %s2058_s26 = sadd.s32 1, %s1897_s24   ;;  %s30_s9 = sadd.s32 1, %s1893_s23 }
  0x3f   : > { %s27_s30 = ssub.s32 %s1897_s24, %s2058_s26  ;;  %p37_p6 = scmp.ne.s32.totalorder %s1893_s23, %s1889_s22 }
  0x40   : > { %p28_p13 = scmp.eq.s32.totalorder %s27_s30, 0  ;;  %p38_p10 = scmp.eq.s32.totalorder %s1897_s24, 0 }
  0x41   : > { %p2296_p5 = scmp.eq.s32.totalorder %s1969_s25, 1  ;;  %p1613_p9 = scmp.lt.s32.totalorder %s1897_s24, 2 }
  0x42   : > { %s2067_s11 = scalar_select %p28_p13, %s1893_s23, %s30_s9  }
  0x43   : > { %p39_p3 = por %p38_p10, %p37_p6  ;;  %p2071_p7 = por %p2296_p5, %p37_p6 }
  0x44   : > { %s233_s8 = sand.u32 1, %s1893_s23   ;;  %s1391_s10 = sshll.u32 %s1897_s24, 7 }
  0x45   : > { %s2297_s12 = scalar_select %p2071_p7, 1, 0 }
  0x46   : > { %s1390_s13 = sshll.u32 %s233_s8, 3  ;;  %s2081_s16 = scalar_lea.hbm %s2282_s0, %s1391_s10 }
  0x47   : > { %s237_s7 = scalar_lea.vmem [#allocation3], %s1390_s13  ;;  %p2085_p11 = pnand %p1613_p9, %p39_p3 }
  0x48   : > { %s244_s17 = sshll.u32 %s237_s7, 4  ;;  %s234_s19 = scalar_lea.sflag [#allocation4], %s233_s8  ;;  %s2083_s17 = int_to_ptr.vmem [resolvable:$true] %s244_s17 }
  0x49   : > { %s1797_s20 = scalar_lea.hbm %s2081_s16, 128  ;;  %p1799_p0 = pneg %p2085_p11 }
  0x4a   : > { %p1798_p12 = scmp.ne.s32.totalorder %s2081_s16, %s1797_s20  ;;  %s1802_s13 = scalar_lea.hbm %s2282_s0, 256 }
  0x4b   : > { %p1803_p13 = scmp.lt.u32.totalorder %s2081_s16, %s2282_s0  ;;  %p1804_p6 = scmp.lt.u32.totalorder %s1802_s13, %s1797_s20 }
  0x4c   : > { %p1800_p2 = pnand %p1799_p0, %p1798_p12  ;;  %p1806_p3 = scmp.lt.u32.totalorder %s1797_s20, %s2081_s16 }
  0x4d   : > { %p1805_p10 = por %p1804_p6, %p1803_p13 }
  0x4e   : > { %p1801_p1 = pneg %p1800_p2 }
  0x4f   : > { %p1807_p5 = por %p1806_p3, %p1805_p10 }
  0x51   : > { %p1808_p9 = pnand %p1807_p5, %p1801_p1 }
  0x53   : > { %1811 = shalt.err (!%p1808_p9)
}
  0x54   : > { %s1812_s8 = scalar_lea.vmem %s2083_s17, 128  ;;  %s1905_s15 = smov [#allocation3]  }
  0x55   : > { %p1813_p12 = scmp.ne.s32.totalorder %s2083_s17, %s1812_s8  ;;  %s1817_s7 = sshll.u32 %s1905_s15, 4  ;;  %s1818_s7 = int_to_ptr.vmem [resolvable:$false] %s1817_s7 }
  0x56   : > { %s1819_s30 = scalar_lea.vmem %s1818_s7, 256  ;;  %p1820_p4 = scmp.lt.s32.totalorder %s2083_s17, %s1818_s7 }
  0x57   : > { %p1815_p2 = pnand %p1813_p12, %p1799_p0  ;;  %p1821_p13 = scmp.lt.s32.totalorder %s1819_s30, %s1812_s8 }
  0x59   : > { %p1816_p7 = pneg %p1815_p2  ;;  %p1822_p6 = por %p1821_p13, %p1820_p4 }
  0x5b   : > { %p1823_p10 = pnand %p1822_p6, %p1816_p7 }
  0x5d   : > { %1826 = shalt.err (!%p1823_p10)
}
  0x5e   : > { %1606 = dma.hbm_to_vmem [thread:$0]  (!%p2085_p11), %s2081_s16, 128, %s2083_s17, %s234_s19  }
  0x5f   : > { %253 = sbr.rel (%p1988_p8) target bundleno = 2304 (0x900), region = 44  ;;  %s2117_s20 = sand.u32 (!%p1988_p8), 1, %s1889_s22  }
  0x60   : > { %s1393_s9 = sshll.u32 (!%p1988_p8), %s2117_s20, 3  ;;  %s256_s13 = scalar_lea.sflag (!%p1988_p8), [#allocation4], %s2117_s20 }
  0x61   : > { %s259_s10 = scalar_lea.vmem (!%p1988_p8), [#allocation3], %s1393_s9  ;;  %p2299_p4 = scmp.ne.s32.totalorder (!%p1988_p8), %s2292_s27, 0 }
  0x66   : > { %1872 = dma.done.wait (%p2299_p4), %s256_s13, 128  }
  0x67   : > { %1874 = vsyncadd (%p2299_p4), %s256_s13, 4294967168  ;;  %p2300_p7 = scmp.eq.s32.totalorder %s1969_s25, 0 }
  0x69   : > { %1876 = dma.done.wait (%p2300_p7), [#allocation7], 4096   ;;  %p2301_p8 = pmov %p2300_p7 }
  0x6a   : > { %v1906_v0 = vmov 0.0   ;;  %v2132_v1 = vld [vmem:[%s259_s10] sm:$0xff]  ;;  %v1685_v4 = vld [vmem:[#allocation6] ss:$12 sps:$4 sm:$0xff]   ;;  %v1907_v22 = vmov 0   ;;  %vm1908_vm0 = vmmov 0  }
  0x6b   : > { %1878 = vsyncadd (%p2301_p8), [#allocation7], 4294963200  ;;  %1488 = vmatprep.subr.bf16.mxu1 %v1906_v0  ;;  %298 = vadd.xlane.f32.xlu0 %v2132_v1  ;;  %v302_v2 = vmul.f32 %v2132_v1, %v2132_v1  ;;  %v1683_v3 = vld [vmem:[#allocation6 + $0x4] ss:$12 sps:$4 sm:$0xff]   ;;  %v1686_v5 = vld [vmem:[#allocation6 + $0x8] ss:$12 sps:$4 sm:$0xff]  }
  0x6c   : > { %489 = vmatprep.subr.bf16.mxu0 %v1683_v3  ;;  %1489 = vmatpush3.bf16.msra.mxu1 %v1686_v5  ;;  %v1687_v6 = vld [vmem:[#allocation6 + $0x1c] ss:$12 sps:$4 sm:$0xff]   ;;  %v1689_v7 = vld [vmem:[#allocation6 + $0x18] ss:$12 sps:$4 sm:$0xff]   ;;  %v1690_v8 = vld [vmem:[#allocation6 + $0x20] ss:$12 sps:$4 sm:$0xff]  }
  0x6d   : > { %490 = vmatpush1.bf16.msra.mxu0 %v1685_v4  ;;  %1490 = vmatprep.subr.bf16.mxu1 %v1906_v0  ;;  %v1691_v9 = vld [vmem:[#allocation6 + $0x34] ss:$12 sps:$4 sm:$0xff]   ;;  %v1693_v10 = vld [vmem:[#allocation6 + $0x30] ss:$12 sps:$4 sm:$0xff]   ;;  %v1694_v11 = vld [vmem:[#allocation6 + $0x38] ss:$12 sps:$4 sm:$0xff]  }
  0x6e   : > { %491 = vmatprep.subr.bf16.mxu0 %v1687_v6  ;;  %v1695_v12 = vld [vmem:[#allocation6 + $0x4c] ss:$12 sps:$4 sm:$0xff]   ;;  %v1697_v13 = vld [vmem:[#allocation6 + $0x48] ss:$12 sps:$4 sm:$0xff]   ;;  %v1698_v14 = vld [vmem:[#allocation6 + $0x50] ss:$12 sps:$4 sm:$0xff]   ;;  %521 = vmatprep.mubr.bf16.mxu0 %v1907_v22 }
  0x6f   : > { %303 = vadd.xlane.f32.xlu0 %v302_v2  ;;  %v1699_v15 = vld [vmem:[#allocation6 + $0x64] ss:$12 sps:$4 sm:$0xff]   ;;  %v1701_v16 = vld [vmem:[#allocation6 + $0x60] ss:$12 sps:$4 sm:$0xff]   ;;  %v1702_v17 = vld [vmem:[#allocation6 + $0x68] ss:$12 sps:$4 sm:$0xff]   ;;  %1504 = vmatprep.mubr.msk.bf16.mxu1 %vm1908_vm0, %v1906_v0 }
  0x70   : > { %1491 = vmatpush3.bf16.msra.mxu1 %v1690_v8  ;;  %v1703_v18 = vld [vmem:[#allocation6 + $0x7c] ss:$12 sps:$4 sm:$0xff]   ;;  %v1705_v19 = vld [vmem:[#allocation6 + $0x78] ss:$12 sps:$4 sm:$0xff]   ;;  %v1706_v20 = vld [vmem:[#allocation6 + $0x80] ss:$12 sps:$4 sm:$0xff]  }
  0x71   : > { %492 = vmatpush1.bf16.msra.mxu0 %v1689_v7  ;;  %1492 = vmatprep.subr.bf16.mxu1 %v1906_v0  ;;  %v1707_v21 = vld [vmem:[#allocation6 + $0x94] ss:$12 sps:$4 sm:$0xff]   ;;  %v1709_v23 = vld [vmem:[#allocation6 + $0x90] ss:$12 sps:$4 sm:$0xff]   ;;  %v1710_v24 = vld [vmem:[#allocation6 + $0x98] ss:$12 sps:$4 sm:$0xff]  }
  0x72   : > { %493 = vmatprep.subr.bf16.mxu0 %v1691_v9  ;;  %v1711_v25 = vld [vmem:[#allocation6 + $0xac] ss:$12 sps:$4 sm:$0xff]   ;;  %v1713_v26 = vld [vmem:[#allocation6 + $0xa8] ss:$12 sps:$4 sm:$0xff]   ;;  %v1714_v27 = vld [vmem:[#allocation6 + $0xb0] ss:$12 sps:$4 sm:$0xff]  }
  0x73   : > { %v1397_v37 = vld [vmem:[%s2283_s1] ss:$0 sm:$0xff]  ;;  %s1909_s18 = smov 96   ;;  %s1910_s19 = smov 64   ;;  %vm605_vm1 = vcmask 261120   ;;  %vm666_vm2 = vcmask 1043456  }
  0x74   : > { %1493 = vmatpush3.bf16.msra.mxu1 %v1694_v11  ;;  %v1398_v39 = vld [vmem:[%s2284_s2] ss:$0 sm:$0xff]  ;;  %vm649_vm3 = vcmask 64512   ;;  %s1911_s14 = smov 32   ;;  %vm711_vm4 = vcmask 257024   ;;  %vm865_vm5 = vcmask 519424  }
  0x75   : > { %494 = vmatpush1.bf16.msra.mxu0 %v1693_v10  ;;  %1494 = vmatprep.subr.bf16.mxu1 %v1906_v0  ;;  %vm1016_vm6 = vcmask 781824   ;;  %vm1167_vm7 = vcmask 1044224   ;;  %s1444_s7 = sshll.u32 %s1969_s25, 7  ;;  %s295_s30 = scalar_lea.vmem [#allocation9], %s1393_s9 }
  0x76   : > { %495 = vmatprep.subr.bf16.mxu0 %v1695_v12  ;;  %s1296_s13 = sshll.u32 %s295_s30, 4  ;;  %s2238_s29 = scalar_lea.hbm %s2288_s6, %s1444_s7  ;;  %s2240_s13 = int_to_ptr.vmem [resolvable:$true] %s1296_s13 }
  0x77   : > { %s1283_s25 = scalar_lea.sflag [#allocation5], %s2117_s20  ;;  %s1827_s16 = scalar_lea.vmem %s2240_s13, 128 }
  0x78   : > { %1495 = vmatpush3.bf16.msra.mxu1 %v1698_v14  ;;  %p1828_p11 = scmp.ne.s32.totalorder %s2240_s13, %s1827_s16  ;;  %p2302_p0 = scmp.ne.s32.totalorder %s2297_s12, 0 }
  0x79   : > { %496 = vmatpush1.bf16.msra.mxu0 %v1697_v13  ;;  %1496 = vmatprep.subr.bf16.mxu1 %v1906_v0  ;;  %s1912_s9 = smov [#allocation9]  }
  0x7a   : > { %497 = vmatprep.subr.bf16.mxu0 %v1699_v15  ;;  %p1829_p1 = pnand %p1828_p11, %p2302_p0  ;;  %s1831_s17 = sshll.u32 %s1912_s9, 4  ;;  %s1832_s17 = int_to_ptr.vmem [resolvable:$false] %s1831_s17 }
  0x7b   : > { %p1834_p5 = scmp.lt.s32.totalorder %s2240_s13, %s1832_s17 }
  0x7c   : > { %1497 = vmatpush3.bf16.msra.mxu1 %v1702_v17  ;;  %p1830_p3 = pneg %p1829_p1 }
  0x7d   : > { %498 = vmatpush1.bf16.msra.mxu0 %v1701_v16  ;;  %1498 = vmatprep.subr.bf16.mxu1 %v1906_v0 }
  0x7e   : > { %499 = vmatprep.subr.bf16.mxu0 %v1703_v18 }
  0x80   : > { %1499 = vmatpush3.bf16.msra.mxu1 %v1706_v20 }
  0x81   : > { %500 = vmatpush1.bf16.msra.mxu0 %v1705_v19  ;;  %1500 = vmatprep.subr.bf16.mxu1 %v1906_v0 }
  0x82   : > { %501 = vmatprep.subr.bf16.mxu0 %v1707_v21 }
  0x84   : > { %1501 = vmatpush3.bf16.msra.mxu1 %v1710_v24 }
  0x85   : > { %502 = vmatpush1.bf16.msra.mxu0 %v1709_v23  ;;  %1502 = vmatprep.subr.bf16.mxu1 %v1906_v0 }
  0x86   : > { %503 = vmatprep.subr.bf16.mxu0 %v1711_v25 }
  0x88   : > { %1503 = vmatpush3.bf16.msra.mxu1 %v1714_v27 }
  0x89   : > { %504 = vmatpush1.bf16.msra.mxu0 %v1713_v26  ;;  %1508 = vmatprep.subr.bf16.mxu1 %v1906_v0 }
  0x8a   : > { %1536 = vmatprep.subr.bf16.mxu0 %v1906_v0 }
  0xf8   : > { %v299_v28 = vpop.xlane.xlu0 %298 }
  0xf9   : > { %v301_v29 = vmul.f32 0.0078125, %v299_v28 }
  0xfb   : > { %v306_v31 = vmul.f32 %v301_v29, %v301_v29  ;;  %v308_v35 = vsub.f32 %v2132_v1, %v301_v29 }
  0xfc   : > { %v304_v30 = vpop.xlane.xlu0 %303 }
  0xfd   : > { %v305_v32 = vmul.f32 0.0078125, %v304_v30 }
  0xff   : > { %v307_v33 = vsub.f32 %v305_v32, %v306_v31 }
 0x101   : > { %v309_v34 = vadd.f32 1e-05, %v307_v33 }
 0x103   : > { %1723 = vrsqrt.f32 %v309_v34 }
 0x10d   : > { %v1724_v36 = vpop.eup %1723 }
 0x10e   : > { %v311_v38 = vmul.f32 %v1724_v36, %v308_v35 }
 0x110   : > { %v319_v40 = vmul.f32 %v1397_v37, %v311_v38 }
 0x112   : > { %v327_v41 = vadd.f32 %v1398_v39, %v319_v40 }
 0x114   : > { %v328_v42 = vpack.c.bf16 %v327_v41, %v327_v41 }
 0x116   : > { %522 = vmatmul.mubr.bf16.vlgmr.msra.gmra.mrb[0].mxu0 %v328_v42  ;;  %1505 = vmatmul.mubr.bf16.vlgmr.msra.gmra.mrb[0].mxu1 %v328_v42 }
 0x117   : > { %1512 = vmatprep.mubr.msk.bf16.mxu1 %vm1908_vm0, %v1906_v0  ;;  %1540 = vmatprep.mubr.msk.bf16.mxu0 %vm1908_vm0, %v1906_v0 }
 0x1e9   : > { %v523_v43 = vpop.f32.mrb[0].mxu0  ;;  %v564_v44 = vpop.f32.mrb[0].mxu1 }
 0x1ea   : > { %v525_v45 = vpop.f32.mrb[1].mxu0  ;;  %v1506_v46 = vpop.f32.mrb[1].mxu1  ;;  %v2162_v57 = vpack.c.bf16 %v564_v44, %v564_v44  ;;  %v570_v58 = vpack.c.bf16 %v523_v43, %v523_v43 }
 0x1eb   : > { %v567_v47 = vpop.f32.mrb[2].mxu1  ;;  %714 = vrot.lane.b32.xlu0 %v525_v45, %s1909_s18  ;;  %571 = vxpose.xlu1.b32.start.end [1/1] (short) (narrow) %v525_v45, 32  ;;  %v527_v48 = vpop.f32.mrb[2].mxu0 }
 0x1ec   : > { %v528_v49 = vpop.f32.mrb[3].mxu0  ;;  %v1507_v50 = vpop.f32.mrb[3].mxu1  ;;  %v668_v59 = vsel %vm666_vm2, %v2162_v57, 0 }
 0x1ef   : > { %867 = vrot.lane.b32.xlu0 %v525_v45, %s1910_s19 }
 0x25d   : > { %v715_v2 = vpop.permute.xlu0 %714 }
 0x261   : > { %v868_v3 = vpop.permute.xlu0 %867 }
 0x262   : > { %v1661_v4 = vpack.i.bf16 %v868_v3, %v715_v2 }
 0x26b   : > { %v587_v51 = vpop.trf.xlu1 }
 0x26f   : > { %v588_v52 = vpop.trf.xlu1 }
 0x270   : > { %v603_v53 = vpack.c.bf16 %v588_v52, %v587_v51 }
 0x272   : > { %1509 = vmatpush3.bf16.msra.mxu1 %v603_v53 }
 0x273   : > { %v589_v54 = vpop.trf.xlu1  ;;  %1510 = vmatprep.subr.bf16.mxu1 %v1906_v0 }
 0x277   : > { %v590_v55 = vpop.trf.xlu1 }
 0x278   : > { %v604_v56 = vpack.c.bf16 %v590_v55, %v589_v54 }
 0x27a   : > { %1511 = vmatpush3.bf16.msra.mxu1 %v604_v56 }
 0x27b   : > { %1516 = vmatprep.subr.bf16.mxu1 %v1906_v0 }
 0x27d   : > { %1513 = vmatmul.mubr.msk.bf16.vlgmr.msra.gmra.mrb[4].mxu1 %vm605_vm1, %v570_v58 }
 0x27e   : > { %1517 = vmatpush3.bf16.msra.mxu1 %v668_v59  ;;  %1518 = vmatprep.mubr.msk.bf16.mxu1 %vm1908_vm0, %v1906_v0 }
 0x27f   : > { %1522 = vmatprep.subr.bf16.mxu1 %v1906_v0 }
 0x350   : > { %v643_v60 = vpop.f32.mrb[4].mxu1 }
 0x351   : > { %v1514_v61 = vpop.f32.mrb[5].mxu1  ;;  %v650_v62 = vsel %vm649_vm3, %v643_v60, -inf }
 0x352   : > { %651 = vmax.xlane.f32.xlu1 %v650_v62  ;;  %v646_v63 = vpop.f32.mrb[6].mxu1 }
 0x353   : > { %v1515_v1 = vpop.f32.mrb[7].mxu1 }
 0x363   : > { %1018 = vrot.lane.b32.xlu1 %v525_v45, %s1911_s14 }
 0x367   : > { %904 = vrot.lane.b32.xlu1 %v570_v58, %s1910_s19 }
 0x390   : > { %1662 = vxpose.xlu1.b32.start.end [1/1] (short) (narrow) %v1661_v4, 32 }
 0x3df   : > { %v652_v5 = vpop.xlane.xlu1 %651 }
 0x3e0   : > { %v653_v6 = vsub.f32 %v643_v60, %v652_v5 }
 0x3e2   : > { %v654_v7 = vmul.f32 1.442695, %v653_v6 }
 0x3e3   : > { %v1019_v10 = vpop.permute.xlu1 %1018 }
 0x3e4   : > { %1725 = vpow2.f32 %v654_v7 }
 0x3e7   : > { %v905_v11 = vpop.permute.xlu1 %904 }
 0x3ee   : > { %v1726_v8 = vpop.eup %1725 }
 0x3ef   : > { %v656_v9 = vsel %vm649_vm3, %v1726_v8, 0.0 }
 0x3f0   : > { %657 = vadd.xlane.f32.xlu0 %v656_v9 }
 0x406   : > { %752 = vrot.lane.b32.xlu0 %v570_v58, %s1909_s18 }
 0x40a   : > { %1055 = vrot.lane.b32.xlu0 %v570_v58, %s1911_s14 }
 0x410   : > { %v1663_v12 = vpop.trf.xlu1 }
 0x411   : > { %v1667_v13 = vunpack.i.h.bf16 %v1663_v12  ;;  %v1664_v14 = vunpack.i.l.bf16 %v1663_v12 }
 0x414   : > { %v1668_v15 = vpop.trf.xlu1 }
 0x415   : > { %v1672_v16 = vunpack.i.h.bf16 %v1668_v15  ;;  %v1669_v17 = vunpack.i.l.bf16 %v1668_v15 }
 0x417   : > { %v902_v18 = vpack.c.bf16 %v1672_v16, %v1667_v13  ;;  %v749_v19 = vpack.c.bf16 %v1669_v17, %v1664_v14 }
 0x418   : > { %v1673_v20 = vpop.trf.xlu1 }
 0x419   : > { %1537 = vmatpush3.bf16.msra.mxu0 %v902_v18  ;;  %v1677_v21 = vunpack.i.h.bf16 %v1673_v20  ;;  %v1674_v28 = vunpack.i.l.bf16 %v1673_v20 }
 0x41a   : > { %1538 = vmatprep.subr.bf16.mxu0 %v1906_v0 }
 0x41c   : > { %v1678_v22 = vpop.trf.xlu1 }
 0x41d   : > { %v1682_v23 = vunpack.i.h.bf16 %v1678_v22  ;;  %v1679_v29 = vunpack.i.l.bf16 %v1678_v22 }
 0x41f   : > { %v903_v24 = vpack.c.bf16 %v1682_v23, %v1677_v21  ;;  %v750_v31 = vpack.c.bf16 %v1679_v29, %v1674_v28 }
 0x421   : > { %1539 = vmatpush3.bf16.msra.mxu0 %v903_v24 }
 0x422   : > { %1550 = vmatprep.subr.bf16.mxu0 %v1906_v0 }
 0x424   : > { %1541 = vmatmul.mubr.msk.bf16.vlgmr.msra.gmra.mrb[4].mxu0 %vm605_vm1, %v905_v11 }
 0x425   : > { %1554 = vmatprep.mubr.msk.bf16.mxu0 %vm1908_vm0, %v1906_v0 }
 0x428   : > { %1021 = vxpose.xlu0.b32.start.end [1/1] (short) (narrow) %v1019_v10, 32 }
 0x47d   : > { %v658_v25 = vpop.xlane.xlu0 %657 }
 0x47e   : > { %1727 = vrcp.f32 %v658_v25 }
 0x481   : > { %v753_v32 = vpop.permute.xlu0 %752 }
 0x485   : > { %v1056_v33 = vpop.permute.xlu0 %1055 }
 0x488   : > { %v1728_v26 = vpop.eup %1727 }
 0x489   : > { %v660_v27 = vmul.f32 %v1728_v26, %v1726_v8 }
 0x48b   : > { %v661_v30 = vpack.c.bf16 %v660_v27, %v660_v27 }
 0x48d   : > { %1519 = vmatmul.mubr.msk.bf16.vlgmr.msra.gmra.mrb[8].mxu1 %vm649_vm3, %v661_v30  ;;  %v1715_v30 = vld [vmem:[#allocation8] sm:$0xff]  }
 0x48e   : > { %1523 = vmatpush3.bf16.msra.mxu1 %v749_v19  ;;  %1526 = vmatprep.mubr.msk.bf16.mxu1 %vm1908_vm0, %v1906_v0 }
 0x48f   : > { %1524 = vmatprep.subr.bf16.mxu1 %v1906_v0 }
 0x492   : > { %1525 = vmatpush3.bf16.msra.mxu1 %v750_v31  ;;  %v1716_v31 = vld [vmem:[#allocation8 + $0x8] sm:$0xff]  }
 0x493   : > { %1530 = vmatprep.subr.bf16.mxu1 %v1906_v0 }
 0x495   : > { %1527 = vmatmul.mubr.msk.bf16.vlgmr.msra.gmra.mrb[12].mxu1 %vm605_vm1, %v753_v32  ;;  %v1717_v32 = vld [vmem:[#allocation8 + $0x10] sm:$0xff]  }
 0x496   : > { %1532 = vmatprep.mubr.msk.bf16.mxu1 %vm1908_vm0, %v1906_v0 }
 0x4a8   : > { %v1037_v34 = vpop.trf.xlu0 }
 0x4ac   : > { %v1038_v35 = vpop.trf.xlu0 }
 0x4ad   : > { %v1053_v36 = vpack.c.bf16 %v1038_v35, %v1037_v34  ;;  %v1718_v34 = vld [vmem:[#allocation8 + $0x18] sm:$0xff]  }
 0x4af   : > { %1551 = vmatpush3.bf16.msra.mxu0 %v1053_v36 }
 0x4b0   : > { %v1039_v37 = vpop.trf.xlu0  ;;  %1552 = vmatprep.subr.bf16.mxu0 %v1906_v0 }
 0x4b4   : > { %v1040_v38 = vpop.trf.xlu0 }
 0x4b5   : > { %v1054_v39 = vpack.c.bf16 %v1040_v38, %v1039_v37 }
 0x4b7   : > { %1553 = vmatpush3.bf16.msra.mxu0 %v1054_v39  ;;  %v1719_v39 = vld [vmem:[#allocation8 + $0x20] sm:$0xff]  }
 0x4b8   : > { %1564 = vmatprep.subr.bf16.mxu0 %v1906_v0 }
 0x4ba   : > { %1555 = vmatmul.mubr.msk.bf16.vlgmr.msra.gmra.mrb[8].mxu0 %vm605_vm1, %v1056_v33 }
 0x4bb   : > { %1580 = vmatprep.mubr.msk.bf16.mxu0 %vm1908_vm0, %v1906_v0  ;;  %1565 = vmatpush3.bf16.msra.mxu0 %v1715_v30 }
 0x4bc   : > { %1566 = vmatprep.subr.bf16.mxu0 %v1906_v0 }
 0x4bf   : > { %1567 = vmatpush3.bf16.msra.mxu0 %v1716_v31 }
 0x4c0   : > { %1568 = vmatprep.subr.bf16.mxu0 %v1906_v0 }
 0x4c3   : > { %1569 = vmatpush3.bf16.msra.mxu0 %v1717_v32 }
 0x4c4   : > { %1570 = vmatprep.subr.bf16.mxu0 %v1906_v0 }
 0x4c7   : > { %1571 = vmatpush3.bf16.msra.mxu0 %v1718_v34 }
 0x4c8   : > { %1572 = vmatprep.subr.bf16.mxu0 %v1906_v0 }
 0x4cb   : > { %1573 = vmatpush3.bf16.msra.mxu0 %v1719_v39 }
 0x4cc   : > { %1574 = vmatprep.subr.bf16.mxu0 %v1906_v0 }
 0x4f7   : > { %v943_v40 = vpop.f32.mrb[4].mxu0 }
 0x4f8   : > { %v1542_v41 = vpop.f32.mrb[5].mxu0  ;;  %v949_v42 = vsel %vm649_vm3, %v943_v40, -inf }
 0x4f9   : > { %950 = vmax.xlane.f32.xlu0 %v949_v42  ;;  %v946_v43 = vpop.f32.mrb[6].mxu0  ;;  %v1721_v41 = vld [vmem:[#allocation8 + $0x30] sm:$0xff]   ;;  %v1722_v42 = vld [vmem:[#allocation8 + $0x38] sm:$0xff]  }
 0x4fa   : > { %v1543_v44 = vpop.f32.mrb[7].mxu0 }
 0x560   : > { %v704_v45 = vpop.f32.mrb[8].mxu1 }
 0x561   : > { %v710_v46 = vpack.c.bf16 %v704_v45, %v704_v45  ;;  %v1520_v47 = vpop.f32.mrb[9].mxu1 }
 0x562   : > { %v707_v48 = vpop.f32.mrb[10].mxu1 }
 0x563   : > { %712 = vst.msk [vmem:[#allocation2] sm:$0xf] %vm711_vm4, %v710_v46  ;;  %v1521_v49 = vpop.f32.mrb[11].mxu1 }
 0x568   : > { %v791_v50 = vpop.f32.mrb[12].mxu1 }
 0x569   : > { %v1528_v51 = vpop.f32.mrb[13].mxu1  ;;  %v797_v52 = vsel %vm649_vm3, %v791_v50, -inf }
 0x56a   : > { %798 = vmax.xlane.f32.xlu1 %v797_v52  ;;  %v794_v53 = vpop.f32.mrb[14].mxu1 }
 0x56b   : > { %v1529_v54 = vpop.f32.mrb[15].mxu1 }
 0x586   : > { %v951_v55 = vpop.xlane.xlu0 %950 }
 0x587   : > { %v952_v56 = vsub.f32 %v943_v40, %v951_v55  ;;  %v1720_v40 = vld [vmem:[#allocation8 + $0x28] sm:$0xff]  }
 0x588   : > { %1575 = vmatpush3.bf16.msra.mxu0 %v1720_v40 }
 0x589   : > { %v953_v58 = vmul.f32 1.442695, %v952_v56  ;;  %1576 = vmatprep.subr.bf16.mxu0 %v1906_v0  ;;  %v1434_v56 = vld [vmem:[%s2287_s5] ss:$0 sm:$0xff] }
 0x58b   : > { %1729 = vpow2.f32 %v953_v58 }
 0x58c   : > { %1577 = vmatpush3.bf16.msra.mxu0 %v1721_v41 }
 0x58d   : > { %v1094_v59 = vpop.f32.mrb[8].mxu0  ;;  %1578 = vmatprep.subr.bf16.mxu0 %v1906_v0 }
 0x58e   : > { %v1556_v60 = vpop.f32.mrb[9].mxu0  ;;  %v1100_v61 = vsel %vm649_vm3, %v1094_v59, -inf }
 0x58f   : > { %1101 = vmax.xlane.f32.xlu1 %v1100_v61  ;;  %v1097_v62 = vpop.f32.mrb[10].mxu0 }
 0x590   : > { %v1557_v63 = vpop.f32.mrb[11].mxu0  ;;  %1579 = vmatpush3.bf16.msra.mxu0 %v1722_v42 }
 0x595   : > { %v1730_v1 = vpop.eup %1729 }
 0x596   : > { %v955_v2 = vsel %vm649_vm3, %v1730_v1, 0.0 }
 0x597   : > { %956 = vadd.xlane.f32.xlu1 %v955_v2 }
 0x5f7   : > { %v799_v3 = vpop.xlane.xlu1 %798 }
 0x5f8   : > { %v800_v4 = vsub.f32 %v791_v50, %v799_v3 }
 0x5fa   : > { %v801_v5 = vmul.f32 1.442695, %v800_v4 }
 0x5fc   : > { %1731 = vpow2.f32 %v801_v5 }
 0x606   : > { %v1732_v6 = vpop.eup %1731 }
 0x607   : > { %v803_v7 = vsel %vm649_vm3, %v1732_v6, 0.0 }
 0x608   : > { %804 = vadd.xlane.f32.xlu1 %v803_v7 }
 0x619   : > { %810 = vrot.lane.b32.xlu1 %v2162_v57, %s1909_s18 }
 0x61c   : > { %v1102_v8 = vpop.xlane.xlu1 %1101 }
 0x61d   : > { %v1103_v9 = vsub.f32 %v1094_v59, %v1102_v8  ;;  %1112 = vrot.lane.b32.xlu1 %v2162_v57, %s1911_s14 }
 0x61f   : > { %v1104_v10 = vmul.f32 1.442695, %v1103_v9 }
 0x621   : > { %1733 = vpow2.f32 %v1104_v10 }
 0x624   : > { %v957_v13 = vpop.xlane.xlu1 %956 }
 0x62b   : > { %v1734_v11 = vpop.eup %1733 }
 0x62c   : > { %v1106_v12 = vsel %vm649_vm3, %v1734_v11, 0.0 }
 0x62d   : > { %1107 = vadd.xlane.f32.xlu0 %v1106_v12 }
 0x643   : > { %961 = vrot.lane.b32.xlu0 %v2162_v57, %s1910_s19 }
 0x695   : > { %v805_v14 = vpop.xlane.xlu1 %804 }
 0x696   : > { %1735 = vrcp.f32 %v805_v14 }
 0x697   : > { %1737 = vrcp.f32 %v957_v13 }
 0x699   : > { %v811_v15 = vpop.permute.xlu1 %810 }
 0x69a   : > { %v816_v16 = vsel %vm666_vm2, %v811_v15, 0 }
 0x69b   : > { %1531 = vmatpush3.bf16.msra.mxu1 %v816_v16 }
 0x69c   : > { %1544 = vmatprep.subr.bf16.mxu1 %v1906_v0 }
 0x69d   : > { %v1113_v24 = vpop.permute.xlu1 %1112 }
 0x69e   : > { %v1118_v26 = vsel %vm666_vm2, %v1113_v24, 0 }
 0x6a0   : > { %v1736_v17 = vpop.eup %1735 }
 0x6a1   : > { %v807_v18 = vmul.f32 %v1736_v17, %v1732_v6  ;;  %v1738_v20 = vpop.eup %1737 }
 0x6a2   : > { %v959_v21 = vmul.f32 %v1738_v20, %v1730_v1 }
 0x6a3   : > { %v808_v19 = vpack.c.bf16 %v807_v18, %v807_v18 }
 0x6a4   : > { %v960_v25 = vpack.c.bf16 %v959_v21, %v959_v21 }
 0x6a5   : > { %1533 = vmatmul.mubr.msk.bf16.vlgmr.msra.gmra.mrb[16].mxu1 %vm649_vm3, %v808_v19 }
 0x6a6   : > { %1546 = vmatprep.mubr.msk.bf16.mxu1 %vm1908_vm0, %v1906_v0 }
 0x6ba   : > { %v1108_v57 = vpop.xlane.xlu0 %1107 }
 0x6bb   : > { %1739 = vrcp.f32 %v1108_v57 }
 0x6be   : > { %v962_v22 = vpop.permute.xlu0 %961 }
 0x6bf   : > { %v967_v23 = vsel %vm666_vm2, %v962_v22, 0 }
 0x6c0   : > { %1545 = vmatpush3.bf16.msra.mxu1 %v967_v23 }
 0x6c1   : > { %1558 = vmatprep.subr.bf16.mxu1 %v1906_v0 }
 0x6c3   : > { %1547 = vmatmul.mubr.msk.bf16.vlgmr.msra.gmra.mrb[20].mxu1 %vm649_vm3, %v960_v25 }
 0x6c4   : > { %1559 = vmatpush3.bf16.msra.mxu1 %v1118_v26  ;;  %1560 = vmatprep.mubr.msk.bf16.mxu1 %vm1908_vm0, %v1906_v0 }
 0x6c5   : > { %v1740_v27 = vpop.eup %1739 }
 0x6c6   : > { %v1110_v28 = vmul.f32 %v1740_v27, %v1734_v11 }
 0x6c8   : > { %v1111_v29 = vpack.c.bf16 %v1110_v28, %v1110_v28 }
 0x6cb   : > { %1561 = vmatmul.mubr.msk.bf16.vlgmr.msra.gmra.mrb[24].mxu1 %vm649_vm3, %v1111_v29 }
 0x778   : > { %v852_v33 = vpop.f32.mrb[16].mxu1 }
 0x779   : > { %v1447_v35 = vpack.c.bf16 %v852_v33, %v852_v33  ;;  %v1534_v36 = vpop.f32.mrb[17].mxu1 }
 0x77a   : > { %v855_v37 = vpop.f32.mrb[18].mxu1 }
 0x77b   : > { %862 = vrot.lane.b32.xlu1 %v1447_v35, %s1911_s14  ;;  %v1535_v38 = vpop.f32.mrb[19].mxu1 }
 0x796   : > { %v1003_v43 = vpop.f32.mrb[20].mxu1 }
 0x797   : > { %v1448_v44 = vpack.c.bf16 %v1003_v43, %v1003_v43  ;;  %v1548_v45 = vpop.f32.mrb[21].mxu1 }
 0x798   : > { %v1006_v46 = vpop.f32.mrb[22].mxu1 }
 0x799   : > { %1013 = vrot.lane.b32.xlu0 %v1448_v44, %s1910_s19  ;;  %v1549_v47 = vpop.f32.mrb[23].mxu1 }
 0x79e   : > { %v1154_v48 = vpop.f32.mrb[24].mxu1 }
 0x79f   : > { %v1449_v49 = vpack.c.bf16 %v1154_v48, %v1154_v48  ;;  %v1562_v50 = vpop.f32.mrb[25].mxu1 }
 0x7a0   : > { %v1157_v51 = vpop.f32.mrb[26].mxu1 }
 0x7a1   : > { %1164 = vrot.lane.b32.xlu1 %v1449_v49, %s1909_s18  ;;  %v1563_v52 = vpop.f32.mrb[27].mxu1  ;;  %s1833_s18 = scalar_lea.vmem %s1832_s17, 256 }
 0x7a2   : > { %p1835_p9 = scmp.lt.s32.totalorder %s1833_s18, %s1827_s16 }
 0x7a4   : > { %p1836_p12 = por %p1835_p9, %p1834_p5 }
 0x7a6   : > { %p1837_p2 = pnand %p1836_p12, %p1830_p3 }
 0x7ed   : > { %v863_v53 = vpop.permute.xlu1 %862 }
 0x7ee   : > { %866 = vst.msk [vmem:[#allocation2] sm:$0xf] %vm865_vm5, %v863_v53 }
 0x80b   : > { %v1014_v0 = vpop.permute.xlu0 %1013 }
 0x80c   : > { %1017 = vst.msk [vmem:[#allocation2] sm:$0xf] %vm1016_vm6, %v1014_v0 }
 0x813   : > { %v1165_v54 = vpop.permute.xlu1 %1164 }
 0x814   : > { %1168 = vst.msk [vmem:[#allocation2] sm:$0xf] %vm1167_vm7, %v1165_v54 }
 0x81b   : > { %v1169_v55 = vld [vmem:[#allocation2] sm:$0xf] }
 0x81c   : > { %1581 = vmatmul.mubr.bf16.vlgmr.msra.gmra.mrb[12].mxu0 %v1169_v55 }
 0x8ef   : > { %v1275_v58 = vpop.f32.mrb[12].mxu0 }
 0x8f0   : > { %v1276_v59 = vadd.f32 %v1434_v56, %v1275_v58  ;;  %v1582_v60 = vpop.f32.mrb[13].mxu0 }
 0x8f1   : > { %v1278_v61 = vpop.f32.mrb[14].mxu0 }
 0x8f2   : > { %1281 = vst [vmem:[%s295_s30] sm:$0xff] %v1276_v59  ;;  %v1583_v62 = vpop.f32.mrb[15].mxu0 }
 0x8f3   : > { %1840 = shalt.err (!%p1837_p2)
}
 0x8f4   : > { %s1841_s20 = scalar_lea.hbm %s2238_s29, 128  ;;  %s1845_s8 = scalar_lea.hbm %s2288_s6, 256 }
 0x8f5   : > { %p1842_p13 = scmp.ne.s32.totalorder %s2238_s29, %s1841_s20  ;;  %p1846_p4 = scmp.lt.u32.totalorder %s2238_s29, %s2288_s6 }
 0x8f6   : > { %p1847_p7 = scmp.lt.u32.totalorder %s1845_s8, %s1841_s20  ;;  %p1849_p11 = scmp.lt.u32.totalorder %s1841_s20, %s2238_s29 }
 0x8f7   : > { %p1843_p6 = pnand %p1842_p13, %p2302_p0 }
 0x8f8   : > { %p1848_p8 = por %p1847_p7, %p1846_p4 }
 0x8f9   : > { %p1844_p10 = pneg %p1843_p6 }
 0x8fa   : > { %p1850_p1 = por %p1849_p11, %p1848_p8 }
 0x8fc   : > { %p1851_p3 = pnand %p1850_p1, %p1844_p10 }
 0x8fe   : > { %1854 = shalt.err (!%p1851_p3)
}
 0x8ff   : > { %1594 = dma.vmem_to_hbm [thread:$0]  (%p2302_p0), %s2240_s13, 128, %s2238_s29, %s1283_s25  }
 0x900 PF: > { %s1308_s30 = sand.u32 1, %s1885_s21   ;;  %p2303_p5 = scmp.ne.s32.totalorder %s2293_s28, 0 }
 0x901   : > { %p2304_p9 = scmp.ge.s32.totalorder %s1897_s24, 2  ;;  %s1309_s10 = scalar_lea.sflag [#allocation5], %s1308_s30 }
 0x903   : > { %p1608_p12 = pnand %p2304_p9, %p2303_p5 }
 0x905   : > { %1880 = dma.done.wait (!%p1608_p12), %s1309_s10, 128  }
 0x906   : > { %1882 = vsyncadd (!%p1608_p12), %s1309_s10, 4294967168  ;;  %p20_p2 = scmp.ge.s32.totalorder %s2058_s26, 4   ;;  %s2305_s21 = smov %s1889_s22 }
 0x907   : > { %s2306_s22 = smov %s1893_s23  ;;  %s2307_s23 = smov %s2067_s11 }
 0x908   : > { %s2308_s24 = smov %s2058_s26  ;;  %22 = sbr.rel (!%p20_p2) target bundleno = 6 (0x6), region = 97 }
 0x90f   :  { %1314 = vsyncpa [#allocation4], 1 }
 0x910   :  { %1316 = vsyncpa [#allocation4 + $0x1], 1 }
 0x911   :  { %1317 = vsyncpa [#allocation7], 1 }
 0x912   :  { %1318 = vsyncpa [#allocation5], 1 }
 0x913   :  { %1320 = vsyncpa [#allocation5 + $0x1], 1 }

</bundles_post_ra>
